<compile_context>
chip_gen: v7x
topology: tpu7x:2x2x1
jax: 0.10.0
libtpu: 0.0.40
codegen_flags: <defaults>
</compile_context>

<pallas_src>
import functools

import jax
import jax.numpy as jnp
from jax.experimental import pallas as pl
from jax.experimental.pallas import tpu as pltpu


def _round_up(n, m):
    return ((n + m - 1) // m) * m


def _pack_params(w1, b1, w2, b2):
    """Pack (w1, b1, w2, b2) into one f32 slab of shape (rows, cols).

    Row layout (static offsets, sliced inside the kernel):
        [0 : in_f)                w1   (in_f, hid)
        [in_f]                    b1   (hid,)
        [in_f+1 : in_f+1+hid)     w2   (hid, lat)    (only first `lat` cols)
        [in_f+1+hid]              b2   (lat,)
    Rows are padded up to a multiple of 8 (sublane alignment).
    """
    in_f, hid = w1.shape
    lat = w2.shape[1]
    cols = max(hid, lat)
    n_rows = _round_up(in_f + 1 + hid + 1, 8)

    slab = jnp.zeros((n_rows, cols), jnp.float32)
    slab = slab.at[0:in_f, 0:hid].set(w1.astype(jnp.float32))
    slab = slab.at[in_f, 0:hid].set(b1.reshape(-1).astype(jnp.float32))
    slab = slab.at[in_f + 1:in_f + 1 + hid, 0:lat].set(w2.astype(jnp.float32))
    slab = slab.at[in_f + 1 + hid, 0:lat].set(b2.reshape(-1).astype(jnp.float32))
    return slab


def _backbone_kernel(x_ref, p_ref, o_ref, *, in_f, hid, lat):
    """Fused forward for one batch tile: sigmoid(sigmoid(x@W1+b1)@W2+b2)."""
    p = p_ref[...]                                    # single packed param slab
    w1 = p[0:in_f, 0:hid]                             # (in_f, hid)
    b1 = p[in_f:in_f + 1, 0:hid]                      # (1, hid)
    w2 = p[in_f + 1:in_f + 1 + hid, 0:lat]            # (hid, lat)
    b2 = p[in_f + 1 + hid:in_f + 2 + hid, 0:lat]      # (1, lat)

    x = x_ref[...]                                    # (TM, in_f)
    h = jnp.dot(x, w1, preferred_element_type=jnp.float32) + b1
    h = jax.nn.sigmoid(h)                             # EUP path

    o = jnp.dot(h, w2, preferred_element_type=jnp.float32) + b2
    o = jax.nn.sigmoid(o)
    o_ref[...] = o.astype(o_ref.dtype)


def backbone_forward(x, w1, b1, w2, b2, *, block_b=512):
    """x: (B, input_size) f32; w1: (input_size, hidden); b1: (1, hidden);
    w2: (hidden, latent); b2: (1, latent). Returns (B, latent) f32."""
    B, in_f = x.shape
    hid = w1.shape[1]
    lat = w2.shape[1]

    params = _pack_params(w1, b1, w2, b2)             # one DMA for all weights

    tm = min(block_b, _round_up(B, 8))                # batch tile, multiple of 8
    grid = (pl.cdiv(B, tm),)

    kernel = functools.partial(_backbone_kernel, in_f=in_f, hid=hid, lat=lat)

    # TODO(synk): if this backbone is ever called inside a larger GLVQ
    # distance kernel, fuse it there instead of a standalone pallas_call.
    return pl.pallas_call(
        kernel,
        out_shape=jax.ShapeDtypeStruct((B, lat), jnp.float32),
        grid=grid,
        in_specs=[
            pl.BlockSpec((tm, in_f), lambda i: (i, 0)),          # batch-tiled x
            pl.BlockSpec(params.shape, lambda i: (0, 0)),        # VMEM-resident params
        ],
        out_specs=pl.BlockSpec((tm, lat), lambda i: (i, 0)),
        compiler_params=pltpu.CompilerParams(
            dimension_semantics=("parallel",)),                  # megacore on v7x
    )(x, params)


def reference_forward(x, w1, b1, w2, b2):
    h = jax.nn.sigmoid(x @ w1 + b1)
    return jax.nn.sigmoid(h @ w2 + b2)


if __name__ == "__main__":
    input_size, hidden_size, latent_size = 4, 10, 2

    key = jax.random.PRNGKey(0)
    kx, kx2, kw1, kb1, kw2, kb2 = jax.random.split(key, 6)

    # Deterministic parameter init (uniform, similar scale to PyTorch Linear default).
    lim1 = 1.0 / (input_size ** 0.5)
    lim2 = 1.0 / (hidden_size ** 0.5)
    w1 = jax.random.uniform(kw1, (input_size, hidden_size), jnp.float32, -lim1, lim1)
    b1 = jax.random.uniform(kb1, (1, hidden_size), jnp.float32, -lim1, lim1)
    w2 = jax.random.uniform(kw2, (hidden_size, latent_size), jnp.float32, -lim2, lim2)
    b2 = jax.random.uniform(kb2, (1, latent_size), jnp.float32, -lim2, lim2)

    # Case 1: small batch, single grid step.
    batch = 8
    x = jax.random.normal(kx, (batch, input_size), jnp.float32)
    out = jax.block_until_ready(backbone_forward(x, w1, b1, w2, b2))
    ref = reference_forward(x, w1, b1, w2, b2)
    assert out.shape == (batch, latent_size)
    assert jnp.allclose(out, ref, atol=1e-5, rtol=1e-5), "mismatch vs reference (B=8)"

    # Case 2: multi-step batch grid (3 tiles of 8) with VMEM-resident params.
    batch2 = 24
    x2 = jax.random.normal(kx2, (batch2, input_size), jnp.float32)
    out2 = jax.block_until_ready(backbone_forward(x2, w1, b1, w2, b2, block_b=8))
    ref2 = reference_forward(x2, w1, b1, w2, b2)
    assert out2.shape == (batch2, latent_size)
    assert jnp.allclose(out2, ref2, atol=1e-5, rtol=1e-5), "mismatch vs reference (B=24)"

    print("KERNEL_OK")
</pallas_src>

<mosaic_0001>
module attributes {stable_mosaic.version = 11 : i64} {
  func.func @_backbone_kernel(%arg0: i32, %arg1: memref<8x4xf32, #tpu.memory_space<vmem>>, %arg2: memref<16x10xf32, #tpu.memory_space<vmem>>, %arg3: memref<8x2xf32, #tpu.memory_space<vmem>>) attributes {dimension_semantics = [#tpu.dimension_semantics<parallel>], iteration_bounds = array<i64: 1>, scalar_prefetch = 0 : i64, scratch_operands = 0 : i64, tpu.core_type = #tpu.core_type<tc>, window_params = [{transform_indices = @transform_0, window_bounds = array<i64: 8, 4>}, {pipeline_mode = #tpu.pipeline_mode<synchronous>, transform_indices = @transform_1, window_bounds = array<i64: 16, 10>}, {transform_indices = @transform_2, window_bounds = array<i64: 8, 2>}]} {
    %c0 = arith.constant 0 : index
    %c0_0 = arith.constant 0 : index
    %0 = vector.load %arg2[%c0, %c0_0] : memref<16x10xf32, #tpu.memory_space<vmem>>, vector<16x10xf32>
    %1 = vector.extract_strided_slice %0 {offsets = [0, 0], sizes = [4, 10], strides = [1, 1]} : vector<16x10xf32> to vector<4x10xf32>
    %2 = vector.extract_strided_slice %0 {offsets = [4, 0], sizes = [1, 10], strides = [1, 1]} : vector<16x10xf32> to vector<1x10xf32>
    %3 = vector.extract_strided_slice %0 {offsets = [5, 0], sizes = [10, 2], strides = [1, 1]} : vector<16x10xf32> to vector<10x2xf32>
    %4 = vector.extract_strided_slice %0 {offsets = [15, 0], sizes = [1, 2], strides = [1, 1]} : vector<16x10xf32> to vector<1x2xf32>
    %c0_1 = arith.constant 0 : index
    %c0_2 = arith.constant 0 : index
    %5 = vector.load %arg1[%c0_1, %c0_2] : memref<8x4xf32, #tpu.memory_space<vmem>>, vector<8x4xf32>
    %cst = arith.constant dense<0.000000e+00> : vector<8x10xf32>
    %6 = tpu.matmul %5, %1, %cst {dimension_numbers = #tpu.dot_dimension_numbers<[1], [0], [0], [1], [0, 0, 1, 1], [], []>} : vector<8x4xf32>, vector<4x10xf32>, vector<8x10xf32> -> vector<8x10xf32>
    %7 = vector.broadcast %2 : vector<1x10xf32> to vector<8x10xf32>
    %8 = arith.addf %6, %7 : vector<8x10xf32>
    %9 = arith.negf %8 : vector<8x10xf32>
    %10 = math.exp %9 : vector<8x10xf32>
    %cst_3 = arith.constant 1.000000e+00 : f32
    %11 = vector.broadcast %cst_3 : f32 to vector<8x10xf32>
    %12 = arith.addf %11, %10 : vector<8x10xf32>
    %13 = arith.divf %11, %12 : vector<8x10xf32>
    %cst_4 = arith.constant dense<0.000000e+00> : vector<8x2xf32>
    %14 = tpu.matmul %13, %3, %cst_4 {dimension_numbers = #tpu.dot_dimension_numbers<[1], [0], [0], [1], [0, 0, 1, 1], [], []>} : vector<8x10xf32>, vector<10x2xf32>, vector<8x2xf32> -> vector<8x2xf32>
    %15 = vector.broadcast %4 : vector<1x2xf32> to vector<8x2xf32>
    %16 = arith.addf %14, %15 : vector<8x2xf32>
    %17 = arith.negf %16 : vector<8x2xf32>
    %18 = math.exp %17 : vector<8x2xf32>
    %cst_5 = arith.constant 1.000000e+00 : f32
    %19 = vector.broadcast %cst_5 : f32 to vector<8x2xf32>
    %20 = arith.addf %19, %18 : vector<8x2xf32>
    %21 = arith.divf %19, %20 : vector<8x2xf32>
    %c0_6 = arith.constant 0 : index
    %c0_7 = arith.constant 0 : index
    %22 = vector.load %arg3[%c0_6, %c0_7] : memref<8x2xf32, #tpu.memory_space<vmem>>, vector<8x2xf32>
    tpu.vector_store %arg3[%c0_6, %c0_7], %21 {strides = array<i32>} : memref<8x2xf32, #tpu.memory_space<vmem>>, vector<8x2xf32>,
    return
  }
  func.func @transform_0(%arg0: i32) -> (i32, i32) {
    %c0_i32 = arith.constant 0 : i32
    %c0_i32_0 = arith.constant 0 : i32
    return %arg0, %c0_i32 : i32, i32
  }
  func.func @transform_1(%arg0: i32) -> (i32, i32) {
    %c0_i32 = arith.constant 0 : i32
    %c0_i32_0 = arith.constant 0 : i32
    %c0_i32_1 = arith.constant 0 : i32
    return %c0_i32, %c0_i32_0 : i32, i32
  }
  func.func @transform_2(%arg0: i32) -> (i32, i32) {
    %c0_i32 = arith.constant 0 : i32
    %c0_i32_0 = arith.constant 0 : i32
    return %arg0, %c0_i32 : i32, i32
  }
}

</mosaic_0001>

<bundles_post_ra>
// kernel: tpu_custom_call.1
= control target key start
LH: loop header
LB: loop body
LE: loop exit
PB: predicated region body
PF: predicated region fallthrough
CT: control target
= control target key end

     0   :  { %7 = vsyncpa [#allocation3], 0  ;;  %s282_s9 = smov [#allocation2]   ;;  %s322_s0 = inlined_call_operand.vmem [shape: f32[8,4], index: 0, kind: input, shape index: {}]   ;;  %s323_s1 = inlined_call_operand.hbm [shape: f32[16,10], index: 1, kind: input, shape index: {}]   ;;  %s324_s2 = inlined_call_operand.vmem [shape: f32[8,2], index: 2, kind: output, shape index: {}]  }
   0x1   :  { %s15_s10 = sshll.u32 %s282_s9, 4  ;;  %s258_s13 = scalar_lea.hbm %s323_s1, 256  ;;  %s16_s10 = int_to_ptr.vmem [resolvable:$true] %s15_s10 }
   0x2   :  { %p259_p0 = scmp.ne.s32.totalorder %s323_s1, %s258_s13  ;;  %p262_p1 = scmp.lt.u32.totalorder %s258_s13, %s323_s1 }
   0x4   :  { %p264_p2 = pnand %p262_p1, %p259_p0 }
   0x6   :  { %267 = shalt.err (!%p264_p2)
}
   0x7   :  { %s268_s18 = scalar_lea.vmem %s16_s10, 256  ;;  %p273_p4 = scmp.lt.s32.totalorder %s16_s10, %s16_s10 }
   0x8   :  { %p269_p3 = scmp.ne.s32.totalorder %s16_s10, %s268_s18  ;;  %p274_p5 = scmp.lt.s32.totalorder %s268_s18, %s268_s18 }
   0xa   :  { %p275_p6 = por %p274_p5, %p273_p4 }
   0xc   :  { %p276_p7 = pnand %p275_p6, %p269_p3 }
   0xe   :  { %279 = shalt.err (!%p276_p7)
}
   0xf   :  { %s283_s19 = smov 128   ;;  %s284_s20 = smov 8  }
  0x10   :  { %21 = dma.hbm_to_vmem [thread:$0]  %s323_s1, 256, %s16_s10, [#allocation3], %s283_s19, %s283_s19, %s284_s20  }
  0x11   :  { %280 = dma.done.wait [#allocation3], 256  }
  0x12   :  { %281 = vsyncadd [#allocation3], 4294967040  ;;  %v285_v0 = vmov 0.0   ;;  %vm286_vm0 = vmmov 0   ;;  %vm36_vm1 = vcmask 1043456   ;;  %vm32_vm2 = vcmask 31744  }
  0x13   :  { %227 = vmatprep.subr.mxu0 %v285_v0  ;;  %229 = vmatprep.mubr.msk.f32.mxu0 %vm286_vm0, %v285_v0  ;;  %v25_v1 = vld [vmem:[#allocation2] sm:$0xff]  ;;  %v26_v4 = vld [vmem:[#allocation2 + $0x8] sm:$0xff]  ;;  %vm121_vm3 = vcmask 1042432   ;;  %vm130_vm4 = vcmask 1041408   ;;  %v287_v5 = vmov 0.0|0.0   ;;  %vm288_vm5 = vmmov 1  }
  0x14   :  { %236 = vmatprep.mubr.msk.f32.mxu1 %vm286_vm0, %v285_v0  ;;  %v27_v2 = vld [vmem:[%s322_s0] sm:$0xff]  ;;  %228 = vmatpush3.msk.msra.mxu0 %vm36_vm1, %v25_v1  ;;  %v122_v3 = vrot.slane %v25_v1, 5  ;;  %v123_v6 = vrot.slane %v26_v4, 5  ;;  %vm241_vm6 = vmpackc.low %vm130_vm4, %vm288_vm5  ;;  %v28_v9 = vlaneseq  ;;  %vm126_vm7 = vcmask 80896  }
  0x15   :  { %230 = vmatmul.mubr.msk.f32.vlgmr.msra.gmra.mrb[0].mxu0 %vm32_vm2, %v27_v2  ;;  %239 = vmatprep.subr.bf16.mxu1 %v287_v5  ;;  %vm209_vm8 = vcmask 15360  }
  0x16   :  { %v124_v7 = vsel %vm121_vm3, %v122_v3, %v123_v6  ;;  %v29_v10 = vshrl.u32 %v28_v9, 7 }
  0x17   :  { %v240_v8 = vpack.c.bf16 %v123_v6, %v124_v7 }
  0x18   :  { %v30_v11 = vsub.s32 4, %v29_v10  ;;  %v118_v20 = vsub.s32 7, %v29_v10 }
  0x19   :  { %242 = vmatpush3.bf16.msk.msra.mxu1 %vm241_vm6, %v240_v8 }
  0x1a   :  { %v31_v12 = vrot.slane %v25_v1, %v30_v11  ;;  %v119_v21 = vrot.slane %v26_v4, %v118_v20 }
  0xe8   :  { %v106_v13 = vpop.f32.mrb[0].mxu0 }
  0xe9   :  { %v107_v14 = vadd.f32 %v106_v13, %v31_v12  ;;  %v231_v15 = vpop.f32.mrb[1].mxu0 }
  0xeb   :  { %v218_v16 = vmul.f32 -1.442695, %v107_v14 }
  0xed   :  { %250 = vpow2.f32 %v218_v16 }
  0xf7   :  { %v251_v17 = vpop.eup %250 }
  0xf8   :  { %v113_v18 = vadd.f32 1.0, %v251_v17 }
  0xfa   :  { %252 = vrcp.f32 %v113_v18 }
 0x104   :  { %v253_v19 = vpop.eup %252 }
 0x105   :  { %237 = vmatmul.mubr.msk.f32.vlgmr.msra.gmra.mrb[0].mxu1 %vm126_vm7, %v253_v19 }
 0x1d8   :  { %v199_v22 = vpop.f32.mrb[0].mxu1 }
 0x1d9   :  { %v200_v23 = vadd.f32 %v199_v22, %v119_v21  ;;  %v238_v24 = vpop.f32.mrb[1].mxu1 }
 0x1db   :  { %v221_v25 = vmul.f32 -1.442695, %v200_v23 }
 0x1dd   :  { %254 = vpow2.f32 %v221_v25 }
 0x1e7   :  { %v255_v26 = vpop.eup %254 }
 0x1e8   :  { %v206_v27 = vadd.f32 1.0, %v255_v26 }
 0x1ea   :  { %256 = vrcp.f32 %v206_v27 }
 0x1f4   :  { %v257_v28 = vpop.eup %256 }
 0x1f5   :  { %210 = vst.msk [vmem:[%s324_s2] sm:$0xff] %vm209_vm8, %v257_v28 }
 0x1f6   :  { %215 = vsyncpa [#allocation3], 1 }

</bundles_post_ra>
